<compile_context>
chip_gen: v6e
topology: v6e:2x2x1
jax: 0.10.0
libtpu: 0.0.40
codegen_flags: <defaults>
</compile_context>

<pallas_src>
import math
import functools

import jax
import jax.numpy as jnp
import numpy as np
from jax import lax
from jax.experimental import pallas as pl
from jax.experimental.pallas import tpu as pltpu

_HI = lax.Precision.HIGHEST


def _encoder_kernel(
    data_ref,    # (R, D)        rows for this grid step (batch dim squeezed)
    mask_ref,    # (1, K) or (R, K)  additive f32 mask (0 / -1e9 / -2e9)
    wqkv_ref,    # (D, 3*D2P)    fused (project @ {WQ,WK,WV}) weights, padded;
                 #               Q columns pre-scaled by 1/sqrt(d2)
    wo_ref,      # (D2P, D2P)    output dense weight, padded
    vec_ref,     # (5, 3*D2P)    rows: b_qkv | bo | gamma | beta | lane_mask
    out_ref,     # (R, D2P)
    *,
    d2: int,     # true double_input_dim (LayerNorm width)
    d2p: int,    # lane-padded width
):
    f32 = jnp.float32
    mm = wqkv_ref.dtype                                  # matmul operand dtype

    x = data_ref[...].astype(mm)                         # (R, D)

    # Fused project->Q/K/V: one matmul, N = 3*D2P lanes, f32 accumulation.
    qkv = jnp.dot(x, wqkv_ref[...], preferred_element_type=f32) + vec_ref[0:1, :]
    q = qkv[:, 0 * d2p:1 * d2p]                          # already 1/sqrt(d2)-scaled
    k = qkv[:, 1 * d2p:2 * d2p]
    v = qkv[:, 2 * d2p:3 * d2p]

    # scores = q_scaled @ k^T; contract last dims directly (transposed-RHS MXU
    # push, no explicit k.T temp).  TODO(synk): verify via pl.lower_as_mlir
    # that Mosaic does not materialize a vxpose of k at large S.
    scores = lax.dot_general(
        q.astype(mm), k.astype(mm),
        dimension_numbers=(((1,), (1,)), ((), ())),
        preferred_element_type=f32,
    )                                                    # (R, K)

    # additive mask: 0 (keep) / -1e9 (masked key) / -2e9 (other batch, folded)
    scores = scores + mask_ref[...]

    # numerically stable softmax over the key axis (exact divide: the ~2^-12
    # error of pl.reciprocal(approx=True) gets amplified by the LayerNorm).
    m = jnp.max(scores, axis=-1, keepdims=True)
    e = jnp.exp(scores - m)
    p = e / jnp.sum(e, axis=-1, keepdims=True)

    # attention output + output dense (padded lanes stay exactly 0)
    attn = jnp.dot(p.astype(mm), v.astype(mm), preferred_element_type=f32)
    y = jnp.dot(attn.astype(mm), wo_ref[...], preferred_element_type=f32) \
        + vec_ref[1:2, :d2p]                             # + bo

    # LayerNorm over the true D2 lanes, eps = 1e-12, elementwise affine.
    inv_d2 = 1.0 / d2
    mean = jnp.sum(y, axis=-1, keepdims=True) * inv_d2   # padded lanes of y are 0
    c = y - mean
    if d2 != d2p:                                        # trace-time branch
        c = c * vec_ref[4:5, :d2p]                       # zero the padded lanes
    var = jnp.sum(c * c, axis=-1, keepdims=True) * inv_d2
    inv_std = 1.0 / jnp.sqrt(var + 1e-12)
    out = c * inv_std * vec_ref[2:3, :d2p] + vec_ref[3:4, :d2p]   # gamma, beta

    out_ref[...] = out.astype(out_ref.dtype)


def _pad_last(a, n_to):
    pad = n_to - a.shape[-1]
    if pad == 0:
        return a
    return jnp.pad(a, [(0, 0)] * (a.ndim - 1) + [(0, pad)])


def _vmem_limit_bytes(rows, mask_rows, D, D2P, mm_itemsize):
    weights = (D * 3 * D2P + D2P * D2P) * mm_itemsize + 5 * 3 * D2P * 4
    streams = (rows * D + mask_rows * rows + rows * D2P) * 4
    temps = (rows * 3 * D2P + 2 * rows * rows + 4 * rows * D2P) * 4
    est = 2 * weights + 2 * streams + temps              # double-buffered + temps
    return int(min(max(est * 3 // 2, 32 << 20), 64 << 20))   # <= v7x physical


def encoder_project_double(data, mask, params, *, matmul_dtype=jnp.float32,
                           fold_batch_threshold=256, return_padded=False):
    """data: (B, S, D) f32;  mask: (B, S) int;  params: dict of weights.

    matmul_dtype=jnp.bfloat16 is recommended on v5e AND v6e/v7x at production
    sizes (the MXU consumes bf16 natively; f32 operands cost extra passes and
    double the resident weight footprint).  f32 accumulation is kept inside
    the kernel either way; the default stays f32 for the tight numeric check.
    """
    B, S, D = data.shape
    D2 = 2 * D
    D2P = pl.cdiv(D2, 128) * 128                         # lane-dense padded width
    f32 = jnp.float32

    # ---- small-problem batch folding (review item) ------------------------
    fold_batch = (B * S) <= fold_batch_threshold
    if fold_batch:
        Bk, Rk, Mq = 1, B * S, B * S
        data_k = data.reshape(1, Rk, D)
        batch_of = jnp.repeat(jnp.arange(B), S)          # (B*S,)
        same = batch_of[:, None] == batch_of[None, :]
        key_mask = mask.reshape(B * S).astype(jnp.int32)
        addmask = jnp.where(
            same,
            jnp.where(key_mask[None, :] == 0, -1e9, 0.0),
            -2e9,                                        # cross-batch: never attend
        ).astype(f32)[None]                              # (1, B*S, B*S)
    else:
        Bk, Rk, Mq = B, S, 1
        data_k = data
        addmask = jnp.where(mask[:, None, :] == 0, -1e9, 0.0).astype(f32)  # (B,1,S)

    # ---- host-side weight prep (done once at model-load time) -------------
    wp, bp = params["wp"], params["bp"]                  # (D, D2), (1, D2)
    scale = 1.0 / math.sqrt(D2)

    def fold(w, b, s=1.0):                               # project folded into head
        return (jnp.dot(wp, w, precision=_HI) * s,
                (jnp.dot(bp, w, precision=_HI) + b) * s)

    wq_f, bq_f = fold(params["wq"], params["bq"], scale)  # 1/sqrt(d_k) folded in
    wk_f, bk_f = fold(params["wk"], params["bk"])
    wv_f, bv_f = fold(params["wv"], params["bv"])

    w_qkv = jnp.concatenate(
        [_pad_last(wq_f, D2P), _pad_last(wk_f, D2P), _pad_last(wv_f, D2P)],
        axis=-1).astype(matmul_dtype)                    # (D, 3*D2P)
    b_qkv = jnp.concatenate(
        [_pad_last(bq_f, D2P), _pad_last(bk_f, D2P), _pad_last(bv_f, D2P)],
        axis=-1).astype(f32)                             # (1, 3*D2P)

    wo_p = jnp.pad(params["wo"], ((0, D2P - D2), (0, D2P - D2))).astype(matmul_dtype)
    bo_p = _pad_last(params["bo"], D2P).astype(f32)
    gamma_p = _pad_last(params["gamma"], D2P).astype(f32)      # padded lanes -> 0
    beta_p = _pad_last(params["beta"], D2P).astype(f32)        # padded lanes -> 0
    lane_mask = (jnp.arange(D2P) < D2).astype(f32)[None, :]    # (1, D2P)

    def row3(a):                                         # (1, D2P) -> (1, 3*D2P)
        return jnp.pad(a, ((0, 0), (0, 2 * D2P)))

    vec = jnp.concatenate(
        [b_qkv, row3(bo_p), row3(gamma_p), row3(beta_p), row3(lane_mask)],
        axis=0)                                          # (5, 3*D2P), f32

    kernel = functools.partial(_encoder_kernel, d2=D2, d2p=D2P)

    def param_spec(shape):                               # grid-invariant full block
        return pl.BlockSpec(shape, lambda b: (0, 0))

    vmem_limit = _vmem_limit_bytes(Rk, Mq, D, D2P, jnp.dtype(matmul_dtype).itemsize)

    out_padded = pl.pallas_call(
        kernel,
        out_shape=jax.ShapeDtypeStruct((Bk, Rk, D2P), f32),
        grid_spec=pltpu.PrefetchScalarGridSpec(
            num_scalar_prefetch=0,
            grid=(Bk,),
            in_specs=[
                pl.BlockSpec((None, Rk, D), lambda b: (b, 0, 0)),     # data
                pl.BlockSpec((None, Mq, Rk), lambda b: (b, 0, 0)),    # additive mask
                param_spec((D, 3 * D2P)),                             # fused QKV W
                param_spec((D2P, D2P)),                               # outputdense W
                param_spec((5, 3 * D2P)),                             # vector params
            ],
            out_specs=pl.BlockSpec((None, Rk, D2P), lambda b: (b, 0, 0)),
        ),
        compiler_params=pltpu.CompilerParams(
            dimension_semantics=("parallel",),
            vmem_limit_bytes=vmem_limit,
        ),
    )(data_k, addmask, w_qkv, wo_p, vec)

    out = out_padded.reshape(B, S, D2P) if fold_batch else out_padded
    if return_padded:
        return out                                       # zero-tailed padded layout
    return out[..., :D2]                                 # strip lane padding


def make_params(key, D):
    """Deterministic synthetic parameters (PyTorch-Linear-like scale)."""
    D2 = 2 * D
    ks = jax.random.split(key, 10)

    def lin(kw, kb, fan_in, fan_out):
        bound = 1.0 / math.sqrt(fan_in)
        w = jax.random.uniform(kw, (fan_in, fan_out), jnp.float32, -bound, bound)
        b = jax.random.uniform(kb, (1, fan_out), jnp.float32, -bound, bound)
        return w, b

    wp, bp = lin(ks[0], ks[1], D, D2)
    wq, bq = lin(ks[2], ks[3], D2, D2)
    wk, bk = lin(ks[4], ks[5], D2, D2)
    wv, bv = lin(ks[6], ks[7], D2, D2)
    wo, bo = lin(ks[8], ks[9], D2, D2)
    gamma = jnp.ones((1, D2), jnp.float32)
    beta = jnp.zeros((1, D2), jnp.float32)
    return dict(wp=wp, bp=bp, wq=wq, bq=bq, wk=wk, bk=bk,
                wv=wv, bv=bv, wo=wo, bo=bo, gamma=gamma, beta=beta)


def reference_jax(data, mask, params):
    """Pure-JAX reference mirroring the PyTorch forward (dropout = identity)."""
    D2 = params["wq"].shape[0]
    h = jnp.dot(data, params["wp"], precision=_HI) + params["bp"]
    q = jnp.dot(h, params["wq"], precision=_HI) + params["bq"]
    k = jnp.dot(h, params["wk"], precision=_HI) + params["bk"]
    v = jnp.dot(h, params["wv"], precision=_HI) + params["bv"]
    scores = jnp.einsum("bqd,bkd->bqk", q, k, precision=_HI) / math.sqrt(D2)
    m = mask[:, None, :]                                 # mask.unsqueeze(1)
    scores = jnp.where(m == 0, -1e9, scores)
    p = jax.nn.softmax(scores, axis=-1)
    x = jnp.einsum("bqk,bkd->bqd", p, v, precision=_HI)
    y = jnp.dot(x, params["wo"], precision=_HI) + params["bo"]
    mean = jnp.mean(y, axis=-1, keepdims=True)
    var = jnp.mean((y - mean) ** 2, axis=-1, keepdims=True)
    return (y - mean) / jnp.sqrt(var + 1e-12) * params["gamma"] + params["beta"]


if __name__ == "__main__":
    B, S, D = 2, 8, 16          # input_dim = 16 -> double_input_dim = 32
    key = jax.random.PRNGKey(0)
    k_data, k_mask, k_param = jax.random.split(key, 3)

    data = jax.random.normal(k_data, (B, S, D), jnp.float32)
    mask = (jax.random.uniform(k_mask, (B, S)) > 0.3).astype(jnp.int32)
    params = make_params(k_param, D)

    with jax.default_matmul_precision("highest"):
        ref = jax.block_until_ready(reference_jax(data, mask, params))

    # default (f32 matmul operands) path -- tight check against PyTorch math
    out = jax.block_until_ready(encoder_project_double(data, mask, params))
    np.testing.assert_allclose(np.asarray(out), np.asarray(ref),
                               rtol=2e-3, atol=2e-3)

    # bf16-operand path (recommended on v5e/v6e/v7x at production sizes);
    # f32 accumulation inside.  Only a loose sanity check: operand rounding is
    # amplified by the LayerNorm's 1/std, so a tight tolerance is not meaningful.
    out_bf16 = jax.block_until_ready(
        encoder_project_double(data, mask, params, matmul_dtype=jnp.bfloat16))
    assert bool(jnp.isfinite(out_bf16).all())
    np.testing.assert_allclose(np.asarray(out_bf16), np.asarray(ref),
                               rtol=2.5e-1, atol=2.5e-1)

    print("KERNEL_OK")
</pallas_src>

<mosaic_0001>
module attributes {stable_mosaic.version = 11 : i64} {
  func.func @_encoder_kernel(%arg0: i32, %arg1: memref<1x16x16xf32, #tpu.memory_space<vmem>>, %arg2: memref<1x16x16xf32, #tpu.memory_space<vmem>>, %arg3: memref<16x384xf32, #tpu.memory_space<vmem>>, %arg4: memref<128x128xf32, #tpu.memory_space<vmem>>, %arg5: memref<5x384xf32, #tpu.memory_space<vmem>>, %arg6: memref<1x16x128xf32, #tpu.memory_space<vmem>>) attributes {dimension_semantics = [#tpu.dimension_semantics<parallel>], iteration_bounds = array<i64: 1>, scalar_prefetch = 0 : i64, scratch_operands = 0 : i64, tpu.core_type = #tpu.core_type<tc>, window_params = [{transform_indices = @transform_0, window_bounds = array<i64: 1, 16, 16>}, {transform_indices = @transform_1, window_bounds = array<i64: 1, 16, 16>}, {pipeline_mode = #tpu.pipeline_mode<synchronous>, transform_indices = @transform_2, window_bounds = array<i64: 16, 384>}, {pipeline_mode = #tpu.pipeline_mode<synchronous>, transform_indices = @transform_3, window_bounds = array<i64: 128, 128>}, {pipeline_mode = #tpu.pipeline_mode<synchronous>, transform_indices = @transform_4, window_bounds = array<i64: 5, 384>}, {transform_indices = @transform_5, window_bounds = array<i64: 1, 16, 128>}]} {
    %c0 = arith.constant 0 : index
    %c0_0 = arith.constant 0 : index
    %c0_1 = arith.constant 0 : index
    %0 = vector.load %arg1[%c0, %c0_0, %c0_1] : memref<1x16x16xf32, #tpu.memory_space<vmem>>, vector<1x16x16xf32>
    %1 = vector.shape_cast %0 : vector<1x16x16xf32> to vector<16x16xf32>
    %c0_2 = arith.constant 0 : index
    %c0_3 = arith.constant 0 : index
    %2 = vector.load %arg3[%c0_2, %c0_3] : memref<16x384xf32, #tpu.memory_space<vmem>>, vector<16x384xf32>
    %cst = arith.constant dense<0.000000e+00> : vector<16x384xf32>
    %3 = tpu.matmul %1, %2, %cst {dimension_numbers = #tpu.dot_dimension_numbers<[1], [0], [0], [1], [0, 0, 1, 1], [], []>} : vector<16x16xf32>, vector<16x384xf32>, vector<16x384xf32> -> vector<16x384xf32>
    %c0_4 = arith.constant 0 : index
    %c0_5 = arith.constant 0 : index
    %4 = vector.load %arg5[%c0_4, %c0_5] : memref<5x384xf32, #tpu.memory_space<vmem>>, vector<1x384xf32>
    %5 = vector.broadcast %4 : vector<1x384xf32> to vector<16x384xf32>
    %6 = arith.addf %3, %5 : vector<16x384xf32>
    %7 = vector.extract_strided_slice %6 {offsets = [0, 0], sizes = [16, 128], strides = [1, 1]} : vector<16x384xf32> to vector<16x128xf32>
    %8 = vector.extract_strided_slice %6 {offsets = [0, 128], sizes = [16, 128], strides = [1, 1]} : vector<16x384xf32> to vector<16x128xf32>
    %9 = vector.extract_strided_slice %6 {offsets = [0, 256], sizes = [16, 128], strides = [1, 1]} : vector<16x384xf32> to vector<16x128xf32>
    %cst_6 = arith.constant dense<0.000000e+00> : vector<16x16xf32>
    %10 = tpu.matmul %7, %8, %cst_6 {dimension_numbers = #tpu.dot_dimension_numbers<[1], [1], [0], [0], [0, 0, 1, 0], [], []>} : vector<16x128xf32>, vector<16x128xf32>, vector<16x16xf32> -> vector<16x16xf32>
    %c0_7 = arith.constant 0 : index
    %c0_8 = arith.constant 0 : index
    %c0_9 = arith.constant 0 : index
    %11 = vector.load %arg2[%c0_7, %c0_8, %c0_9] : memref<1x16x16xf32, #tpu.memory_space<vmem>>, vector<1x16x16xf32>
    %12 = vector.shape_cast %11 : vector<1x16x16xf32> to vector<16x16xf32>
    %13 = arith.addf %10, %12 : vector<16x16xf32>
    %cst_10 = arith.constant dense<0xFF800000> : vector<16xf32>
    %14 = vector.multi_reduction <maximumf>, %13, %cst_10 [1] : vector<16x16xf32> to vector<16xf32>
    %15 = vector.shape_cast %14 : vector<16xf32> to vector<16x1xf32>
    %16 = vector.broadcast %15 : vector<16x1xf32> to vector<16x16xf32>
    %17 = arith.subf %13, %16 : vector<16x16xf32>
    %18 = math.exp %17 : vector<16x16xf32>
    %cst_11 = arith.constant dense<0.000000e+00> : vector<16xf32>
    %19 = vector.multi_reduction <add>, %18, %cst_11 [1] : vector<16x16xf32> to vector<16xf32>
    %20 = vector.shape_cast %19 : vector<16xf32> to vector<16x1xf32>
    %21 = vector.broadcast %20 : vector<16x1xf32> to vector<16x16xf32>
    %22 = arith.divf %18, %21 : vector<16x16xf32>
    %cst_12 = arith.constant dense<0.000000e+00> : vector<16x128xf32>
    %23 = tpu.matmul %22, %9, %cst_12 {dimension_numbers = #tpu.dot_dimension_numbers<[1], [0], [0], [1], [0, 0, 1, 1], [], []>} : vector<16x16xf32>, vector<16x128xf32>, vector<16x128xf32> -> vector<16x128xf32>
    %c0_13 = arith.constant 0 : index
    %c0_14 = arith.constant 0 : index
    %24 = vector.load %arg4[%c0_13, %c0_14] : memref<128x128xf32, #tpu.memory_space<vmem>>, vector<128x128xf32>
    %cst_15 = arith.constant dense<0.000000e+00> : vector<16x128xf32>
    %25 = tpu.matmul %23, %24, %cst_15 {dimension_numbers = #tpu.dot_dimension_numbers<[1], [0], [0], [1], [0, 0, 1, 1], [], []>} : vector<16x128xf32>, vector<128x128xf32>, vector<16x128xf32> -> vector<16x128xf32>
    %c1 = arith.constant 1 : index
    %c0_16 = arith.constant 0 : index
    %26 = vector.load %arg5[%c1, %c0_16] : memref<5x384xf32, #tpu.memory_space<vmem>>, vector<1x128xf32>
    %27 = vector.broadcast %26 : vector<1x128xf32> to vector<16x128xf32>
    %28 = arith.addf %25, %27 : vector<16x128xf32>
    %cst_17 = arith.constant dense<0.000000e+00> : vector<16xf32>
    %29 = vector.multi_reduction <add>, %28, %cst_17 [1] : vector<16x128xf32> to vector<16xf32>
    %30 = vector.shape_cast %29 : vector<16xf32> to vector<16x1xf32>
    %cst_18 = arith.constant 3.125000e-02 : f32
    %31 = vector.broadcast %cst_18 : f32 to vector<16x1xf32>
    %32 = arith.mulf %30, %31 : vector<16x1xf32>
    %33 = vector.broadcast %32 : vector<16x1xf32> to vector<16x128xf32>
    %34 = arith.subf %28, %33 : vector<16x128xf32>
    %c4 = arith.constant 4 : index
    %c0_19 = arith.constant 0 : index
    %35 = vector.load %arg5[%c4, %c0_19] : memref<5x384xf32, #tpu.memory_space<vmem>>, vector<1x128xf32>
    %36 = vector.broadcast %35 : vector<1x128xf32> to vector<16x128xf32>
    %37 = arith.mulf %34, %36 : vector<16x128xf32>
    %38 = arith.mulf %37, %37 : vector<16x128xf32>
    %cst_20 = arith.constant dense<0.000000e+00> : vector<16xf32>
    %39 = vector.multi_reduction <add>, %38, %cst_20 [1] : vector<16x128xf32> to vector<16xf32>
    %40 = vector.shape_cast %39 : vector<16xf32> to vector<16x1xf32>
    %cst_21 = arith.constant 3.125000e-02 : f32
    %41 = vector.broadcast %cst_21 : f32 to vector<16x1xf32>
    %42 = arith.mulf %40, %41 : vector<16x1xf32>
    %cst_22 = arith.constant 9.99999996E-13 : f32
    %43 = vector.broadcast %cst_22 : f32 to vector<16x1xf32>
    %44 = arith.addf %42, %43 : vector<16x1xf32>
    %45 = math.sqrt %44 : vector<16x1xf32>
    %cst_23 = arith.constant 1.000000e+00 : f32
    %46 = vector.broadcast %cst_23 : f32 to vector<16x1xf32>
    %47 = arith.divf %46, %45 : vector<16x1xf32>
    %48 = vector.broadcast %47 : vector<16x1xf32> to vector<16x128xf32>
    %49 = arith.mulf %37, %48 : vector<16x128xf32>
    %c2 = arith.constant 2 : index
    %c0_24 = arith.constant 0 : index
    %50 = vector.load %arg5[%c2, %c0_24] : memref<5x384xf32, #tpu.memory_space<vmem>>, vector<1x128xf32>
    %51 = vector.broadcast %50 : vector<1x128xf32> to vector<16x128xf32>
    %52 = arith.mulf %49, %51 : vector<16x128xf32>
    %c3 = arith.constant 3 : index
    %c0_25 = arith.constant 0 : index
    %53 = vector.load %arg5[%c3, %c0_25] : memref<5x384xf32, #tpu.memory_space<vmem>>, vector<1x128xf32>
    %54 = vector.broadcast %53 : vector<1x128xf32> to vector<16x128xf32>
    %55 = arith.addf %52, %54 : vector<16x128xf32>
    %c0_26 = arith.constant 0 : index
    %c0_27 = arith.constant 0 : index
    %c0_28 = arith.constant 0 : index
    %56 = vector.load %arg6[%c0_26, %c0_27, %c0_28] : memref<1x16x128xf32, #tpu.memory_space<vmem>>, vector<1x16x128xf32>
    %57 = vector.shape_cast %56 : vector<1x16x128xf32> to vector<16x128xf32>
    %58 = vector.shape_cast %55 : vector<16x128xf32> to vector<1x16x128xf32>
    tpu.vector_store %arg6[%c0_26, %c0_27, %c0_28], %58 {strides = array<i32>} : memref<1x16x128xf32, #tpu.memory_space<vmem>>, vector<1x16x128xf32>,
    return
  }
  func.func @transform_0(%arg0: i32) -> (i32, i32, i32) {
    %c0_i32 = arith.constant 0 : i32
    %c0_i32_0 = arith.constant 0 : i32
    %c0_i32_1 = arith.constant 0 : i32
    return %arg0, %c0_i32, %c0_i32_0 : i32, i32, i32
  }
  func.func @transform_1(%arg0: i32) -> (i32, i32, i32) {
    %c0_i32 = arith.constant 0 : i32
    %c0_i32_0 = arith.constant 0 : i32
    %c0_i32_1 = arith.constant 0 : i32
    return %arg0, %c0_i32, %c0_i32_0 : i32, i32, i32
  }
  func.func @transform_2(%arg0: i32) -> (i32, i32) {
    %c0_i32 = arith.constant 0 : i32
    %c0_i32_0 = arith.constant 0 : i32
    %c0_i32_1 = arith.constant 0 : i32
    return %c0_i32, %c0_i32_0 : i32, i32
  }
  func.func @transform_3(%arg0: i32) -> (i32, i32) {
    %c0_i32 = arith.constant 0 : i32
    %c0_i32_0 = arith.constant 0 : i32
    %c0_i32_1 = arith.constant 0 : i32
    return %c0_i32, %c0_i32_0 : i32, i32
  }
  func.func @transform_4(%arg0: i32) -> (i32, i32) {
    %c0_i32 = arith.constant 0 : i32
    %c0_i32_0 = arith.constant 0 : i32
    %c0_i32_1 = arith.constant 0 : i32
    return %c0_i32, %c0_i32_0 : i32, i32
  }
  func.func @transform_5(%arg0: i32) -> (i32, i32, i32) {
    %c0_i32 = arith.constant 0 : i32
    %c0_i32_0 = arith.constant 0 : i32
    %c0_i32_1 = arith.constant 0 : i32
    return %arg0, %c0_i32, %c0_i32_0 : i32, i32, i32
  }
}

</mosaic_0001>

<bundles_post_ra>
// kernel: tpu_custom_call.1
= control target key start
LH: loop header
LB: loop body
LE: loop exit
PB: predicated region body
PF: predicated region fallthrough
CT: control target
= control target key end

     0   :  { %10 = vsyncpa [#allocation3], 0  ;;  %s939_s0 = inlined_call_operand.hbm [shape: f32[1,16,16], index: 0, kind: input, shape index: {}]   ;;  %s940_s1 = inlined_call_operand.hbm [shape: f32[1,16,16], index: 1, kind: input, shape index: {}]   ;;  %s941_s2 = inlined_call_operand.hbm [shape: f32[16,384], index: 2, kind: input, shape index: {}]   ;;  %s942_s3 = inlined_call_operand.hbm [shape: f32[128,128], index: 3, kind: input, shape index: {}]   ;;  %s943_s4 = inlined_call_operand.hbm [shape: f32[5,384], index: 4, kind: input, shape index: {}]   ;;  %s944_s5 = inlined_call_operand.hbm [shape: f32[1,16,128], index: 5, kind: output, shape index: {}]  }
   0x1   :  { %11 = vsyncpa [#allocation6], 0 }
   0x2   :  { %12 = vsyncpa [#allocation9], 0 }
   0x3   :  { %13 = vsyncpa [#allocation4], 0  ;;  %s858_s18 = smov [#allocation5]   ;;  %s859_s20 = smov [#allocation8]  }
   0x4   :  { %s31_s19 = sshll.u32 %s858_s18, 4  ;;  %s55_s21 = sshll.u32 %s859_s20, 4  ;;  %s32_s19 = int_to_ptr.vmem [resolvable:$true] %s31_s19  ;;  %s56_s21 = int_to_ptr.vmem [resolvable:$true] %s55_s21 }
   0x5   :  { %s738_s22 = scalar_lea.vmem %s32_s19, 256  ;;  %p743_p1 = scmp.lt.s32.totalorder %s32_s19, %s32_s19 }
   0x6   :  { %p739_p0 = scmp.ne.s32.totalorder %s32_s19, %s738_s22  ;;  %p744_p2 = scmp.lt.s32.totalorder %s738_s22, %s738_s22 }
   0x8   :  { %p745_p3 = por %p744_p2, %p743_p1 }
   0xa   :  { %p746_p4 = pnand %p745_p3, %p739_p0 }
   0xc   :  { %749 = shalt.err (!%p746_p4)
}
   0xd   :  { %s860_s23 = smov 128   ;;  %s861_s24 = smov 8  }
   0xe   :  { %37 = dma.hbm_to_vmem [thread:$0]  %s940_s1, 256, %s32_s19, [#allocation6], %s860_s23, %s860_s23, %s861_s24  }
   0xf   :  { %s758_s27 = scalar_lea.vmem %s56_s21, 2048  ;;  %p763_p6 = scmp.lt.s32.totalorder %s56_s21, %s56_s21 }
  0x10   :  { %p759_p5 = scmp.ne.s32.totalorder %s56_s21, %s758_s27  ;;  %p764_p7 = scmp.lt.s32.totalorder %s758_s27, %s758_s27 }
  0x12   :  { %p765_p8 = por %p764_p7, %p763_p6 }
  0x14   :  { %p766_p9 = pnand %p765_p8, %p759_p5 }
  0x16   :  { %769 = shalt.err (!%p766_p9)
}
  0x17   :  { %61 = dma.hbm_to_vmem [thread:$0]  %s942_s3, 2048, %s56_s21, [#allocation9], %s860_s23, %s860_s23, %s861_s24  }
  0x18   :  { %s862_s30 = smov [#allocation2]   ;;  %s863_s7 = smov [#allocation7]  }
  0x19   :  { %s19_s6 = sshll.u32 %s862_s30, 4  ;;  %s43_s8 = sshll.u32 %s863_s7, 4  ;;  %s20_s6 = int_to_ptr.vmem [resolvable:$true] %s19_s6  ;;  %s44_s8 = int_to_ptr.vmem [resolvable:$true] %s43_s8 }
  0x1a   :  { %s778_s1 = scalar_lea.vmem %s20_s6, 256  ;;  %p783_p11 = scmp.lt.s32.totalorder %s20_s6, %s20_s6 }
  0x1b   :  { %p779_p10 = scmp.ne.s32.totalorder %s20_s6, %s778_s1  ;;  %p784_p12 = scmp.lt.s32.totalorder %s778_s1, %s778_s1 }
  0x1d   :  { %p785_p13 = por %p784_p12, %p783_p11 }
  0x1f   :  { %p786_p0 = pnand %p785_p13, %p779_p10 }
  0x21   :  { %789 = shalt.err (!%p786_p0)
}
  0x22   :  { %25 = dma.hbm_to_vmem [thread:$0]  %s939_s0, 256, %s20_s6, [#allocation3], %s860_s23, %s860_s23, %s861_s24  }
  0x23   :  { %s798_s3 = scalar_lea.vmem %s44_s8, 768  ;;  %p803_p2 = scmp.lt.s32.totalorder %s44_s8, %s44_s8 }
  0x24   :  { %p799_p1 = scmp.ne.s32.totalorder %s44_s8, %s798_s3  ;;  %p804_p3 = scmp.lt.s32.totalorder %s798_s3, %s798_s3 }
  0x26   :  { %p805_p4 = por %p804_p3, %p803_p2 }
  0x28   :  { %p806_p5 = pnand %p805_p4, %p799_p1 }
  0x2a   :  { %809 = shalt.err (!%p806_p5)
}
  0x2b   :  { %s864_s11 = smov 384   ;;  %s865_s12 = smov 24  }
  0x2c   :  { %49 = dma.hbm_to_vmem [thread:$0]  %s941_s2, 768, %s44_s8, [#allocation6], %s864_s11, %s864_s11, %s865_s12  }
  0x2d   :  { %s866_s15 = smov [#allocation10]  }
  0x2e   :  { %s68_s16 = sshll.u32 %s866_s15, 4  ;;  %s69_s16 = int_to_ptr.vmem [resolvable:$true] %s68_s16 }
  0x2f   :  { %s818_s17 = scalar_lea.vmem %s69_s16, 384  ;;  %p823_p7 = scmp.lt.s32.totalorder %s69_s16, %s69_s16 }
  0x30   :  { %p819_p6 = scmp.ne.s32.totalorder %s69_s16, %s818_s17  ;;  %p824_p8 = scmp.lt.s32.totalorder %s818_s17, %s818_s17 }
  0x32   :  { %p825_p9 = por %p824_p8, %p823_p7 }
  0x34   :  { %p826_p10 = pnand %p825_p9, %p819_p6 }
  0x36   :  { %829 = shalt.err (!%p826_p10)
}
  0x37   :  { %71 = dma.hbm_to_vmem [thread:$0]  %s943_s4, 384, %s69_s16, [#allocation9]  }
  0x38   :  { %850 = dma.done.wait [#allocation3], 256  }
  0x39   :  { %851 = vsyncadd [#allocation3], 4294967040 }
  0x3a   :  { %852 = dma.done.wait [#allocation6], 1024  }
  0x3b   :  { %853 = vsyncadd [#allocation6], 4294966272 }
  0x3c   :  { %854 = dma.done.wait [#allocation9], 2432  }
  0x3d   :  { %855 = vsyncadd [#allocation9], 4294964864  ;;  %v867_v0 = vmov 0.0   ;;  %v93_v1 = vld [vmem:[#allocation7 + $0x20] sm:$0xff]  ;;  %v92_v2 = vld [vmem:[#allocation7 + $0x18] sm:$0xff]  ;;  %vm112_vm0 = vcmask 130048   ;;  %v97_v9 = vlaneseq }
  0x3e   :  { %183 = vmatprep.mubr.f32.mxu0 %v867_v0  ;;  %v90_v3 = vld [vmem:[#allocation7 + $0x8] sm:$0xff]  ;;  %147 = vmatprep.subr.mxu0 %v93_v1  ;;  %v89_v4 = vld [vmem:[#allocation7] sm:$0xff]  ;;  %v91_v8 = vld [vmem:[#allocation7 + $0x10] sm:$0xff]  ;;  %s868_s2 = smov [#allocation11]  }
  0x3f   :  { %148 = vmatpush1.msra.mxu0 %v92_v2  ;;  %v87_v5 = vld [vmem:[#allocation2] sm:$0xff]  ;;  %v94_v6 = vld [vmem:[#allocation7 + $0x28] sm:$0xff]  ;;  %v98_v10 = vshrl.u32 %v97_v9, 7  ;;  %v271_v31 = vld [vmem:[#allocation5] sm:$0xff]  ;;  %s597_s4 = sshll.u32 %s868_s2, 4  ;;  %s598_s4 = int_to_ptr.vmem [resolvable:$true] %s597_s4 }
  0x40   :  { %149 = vmatprep.subr.mxu0 %v90_v3  ;;  %v88_v7 = vld [vmem:[#allocation2 + $0x8] sm:$0xff]  ;;  %v95_v12 = vld [vmem:[#allocation10] ss:$8 sm:$0x7]  ;;  %s830_s19 = scalar_lea.vmem %s598_s4, 256  ;;  %p835_p12 = scmp.lt.s32.totalorder %s598_s4, %s598_s4 }
  0x41   :  { %150 = vmatpush1.msra.mxu0 %v89_v4  ;;  %v99_v11 = vsub.s32 0, %v98_v10  ;;  %v103_v16 = vsub.s32 1, %v98_v10  ;;  %v107_v24 = vsub.s32 2, %v98_v10  ;;  %v272_v32 = vld [vmem:[#allocation5 + $0x8] sm:$0xff]  ;;  %v466_v48 = vld [vmem:[#allocation8 + $0x78] sm:$0xff]  ;;  %v465_v49 = vld [vmem:[#allocation8 + $0x70] sm:$0xff]  ;;  %p831_p11 = scmp.ne.s32.totalorder %s598_s4, %s830_s19  ;;  %p836_p13 = scmp.lt.s32.totalorder %s830_s19, %s830_s19 }
  0x42   :  { %611 = vmatmul.mubr.msk.f32.vlgmr.msra.gmra.mxu0 %vm112_vm0, %v87_v5  ;;  %647 = vmatprep.subr.mxu0 %v94_v6  ;;  %v464_v50 = vld [vmem:[#allocation8 + $0x68] sm:$0xff]  ;;  %v463_v51 = vld [vmem:[#allocation8 + $0x60] sm:$0xff]  ;;  %v462_v52 = vld [vmem:[#allocation8 + $0x58] sm:$0xff] }
  0x43   :  { %189 = vmatprep.mubr.f32.mxu0 %v867_v0  ;;  %648 = vmatpush3.msra.mxu0 %v94_v6  ;;  %v100_v13 = vrot.slane %v95_v12, %v99_v11  ;;  %v104_v19 = vrot.slane %v95_v12, %v103_v16  ;;  %v108_v25 = vrot.slane %v95_v12, %v107_v24  ;;  %v461_v53 = vld [vmem:[#allocation8 + $0x50] sm:$0xff]  ;;  %v460_v54 = vld [vmem:[#allocation8 + $0x48] sm:$0xff]  ;;  %v459_v55 = vld [vmem:[#allocation8 + $0x40] sm:$0xff]  ;;  %p837_p0 = por %p836_p13, %p835_p12 }
  0x44   :  { %649 = vmatprep.subr.mxu0 %v91_v8  ;;  %668 = vmatprep.subr.mxu1 %v466_v48  ;;  %v458_v56 = vld [vmem:[#allocation8 + $0x38] sm:$0xff]  ;;  %v457_v57 = vld [vmem:[#allocation8 + $0x30] sm:$0xff]  ;;  %v456_v58 = vld [vmem:[#allocation8 + $0x28] sm:$0xff] }
  0x45   :  { %650 = vmatpush3.msra.mxu0 %v91_v8  ;;  %669 = vmatpush3.msra.mxu1 %v466_v48  ;;  %v455_v59 = vld [vmem:[#allocation8 + $0x20] sm:$0xff]  ;;  %v454_v60 = vld [vmem:[#allocation8 + $0x18] sm:$0xff]  ;;  %v453_v61 = vld [vmem:[#allocation8 + $0x10] sm:$0xff]  ;;  %p838_p1 = pnand %p837_p0, %p831_p11 }
  0x46   :  { %612 = vmatmul.mubr.msk.f32.gmra.mxu0 %vm112_vm0, %v88_v7  ;;  %670 = vmatprep.subr.mxu1 %v465_v49  ;;  %v452_v4 = vld [vmem:[#allocation8 + $0x8] sm:$0xff]  ;;  %v467_v8 = vld [vmem:[#allocation10 + $0x1] ss:$0 sm:$0xff]  ;;  %v551_v16 = vld [vmem:[#allocation10 + $0x4] ss:$0 sm:$0xff] }
  0x47   :  { %651 = vmatprep.mubr.msk.f32.mxu0 %vm112_vm0, %v87_v5  ;;  %671 = vmatpush3.msra.mxu1 %v465_v49  ;;  %v451_v5 = vld [vmem:[#allocation8] sm:$0xff] }
  0x48   :  { %672 = vmatprep.subr.mxu1 %v464_v50 }
  0x49   :  { %673 = vmatpush3.msra.mxu1 %v464_v50 }
  0x4a   :  { %652 = vmatmul.mubr.msk.f32.vlgmr.msra.gmra.mxu0 %vm112_vm0, %v88_v7  ;;  %674 = vmatprep.subr.mxu1 %v463_v51 }
  0x4b   :  { %675 = vmatpush3.msra.mxu1 %v463_v51 }
  0x4c   :  { %676 = vmatprep.subr.mxu1 %v462_v52 }
  0x4d   :  { %677 = vmatpush3.msra.mxu1 %v462_v52 }
  0x4e   :  { %678 = vmatprep.subr.mxu1 %v461_v53 }
  0x4f   :  { %679 = vmatpush3.msra.mxu1 %v461_v53 }
  0x50   :  { %680 = vmatprep.subr.mxu1 %v460_v54 }
  0x51   :  { %681 = vmatpush3.msra.mxu1 %v460_v54 }
  0x52   :  { %682 = vmatprep.subr.mxu1 %v459_v55 }
  0x53   :  { %683 = vmatpush3.msra.mxu1 %v459_v55 }
  0x54   :  { %684 = vmatprep.subr.mxu1 %v458_v56 }
  0x55   :  { %685 = vmatpush3.msra.mxu1 %v458_v56 }
  0x56   :  { %686 = vmatprep.subr.mxu1 %v457_v57 }
  0x57   :  { %687 = vmatpush3.msra.mxu1 %v457_v57 }
  0x58   :  { %688 = vmatprep.subr.mxu1 %v456_v58 }
  0x59   :  { %689 = vmatpush3.msra.mxu1 %v456_v58 }
  0x5a   :  { %690 = vmatprep.subr.mxu1 %v455_v59 }
  0x5b   :  { %691 = vmatpush3.msra.mxu1 %v455_v59 }
  0x5c   :  { %692 = vmatprep.subr.mxu1 %v454_v60 }
  0x5d   :  { %693 = vmatpush3.msra.mxu1 %v454_v60 }
  0x5e   :  { %694 = vmatprep.subr.mxu1 %v453_v61 }
  0x5f   :  { %695 = vmatpush3.msra.mxu1 %v453_v61 }
  0x60   :  { %696 = vmatprep.subr.mxu1 %v452_v4 }
  0x61   :  { %697 = vmatpush3.msra.mxu1 %v452_v4 }
  0x62   :  { %698 = vmatprep.subr.mxu1 %v451_v5 }
  0x63   :  { %699 = vmatpush3.msra.mxu1 %v451_v5 }
 0x102   :  { %v185_v14 = vpop.f32.mrf.mxu0 }
 0x103   :  { %v186_v15 = vadd.f32 %v185_v14, %v100_v13 }
 0x104   :  { %v187_v17 = vpop.f32.mrf.mxu0 }
 0x105   :  { %658 = vmatprep.mubr.f32.mxu0 %v186_v15  ;;  %v188_v22 = vadd.f32 %v187_v17, %v104_v19 }
 0x106   :  { %v191_v18 = vpop.f32.mrf.mxu0 }
 0x107   :  { %v192_v23 = vadd.f32 %v191_v18, %v100_v13 }
 0x108   :  { %v193_v20 = vpop.f32.mrf.mxu0 }
 0x109   :  { %v194_v21 = vadd.f32 %v193_v20, %v104_v19 }
 0x10a   :  { %v653_v26 = vpop.f32.mrf.mxu0 }
 0x10b   :  { %654 = vmatprep.subr.mxu0 %v194_v21  ;;  %v268_v27 = vadd.f32 %v653_v26, %v108_v25 }
 0x10c   :  { %655 = vmatpush3.xpose.msra.mxu0 %v194_v21  ;;  %v262_v28 = vpop.f32.mrf.mxu0 }
 0x10d   :  { %656 = vmatprep.subr.mxu0 %v188_v22  ;;  %v263_v29 = vadd.f32 %v262_v28, %v108_v25 }
 0x110   :  { %657 = vmatpush3.xpose.msra.mxu0 %v188_v22 }
 0x111   :  { %661 = vmatprep.subr.mxu0 %v268_v27 }
 0x113   :  { %659 = vmatmul.mubr.f32.vlgmr.msra.gmra.mxu0 %v192_v23 }
 0x114   :  { %662 = vmatpush3.msra.mxu0 %v268_v27 }
 0x115   :  { %663 = vmatprep.subr.mxu0 %v263_v29 }
 0x116   :  { %664 = vmatpush3.msra.mxu0 %v263_v29 }
 0x1d3   :  { %v660_v30 = vpop.f32.mrf.mxu0 }
 0x1d4   :  { %v345_v35 = vadd.f32 %v660_v30, %v272_v32 }
 0x1d5   :  { %v339_v33 = vpop.f32.mrf.mxu0 }
 0x1d6   :  { %v340_v34 = vadd.f32 %v339_v33, %v271_v31  ;;  %v351_v37 = vsel %vm112_vm0, %v345_v35, -inf }
 0x1d8   :  { %v348_v36 = vsel %vm112_vm0, %v340_v34, -inf }
 0x1d9   :  { %349 = vmax.xlane.f32.xlu0 %v348_v36 }
 0x1dd   :  { %352 = vmax.xlane.f32.xlu0 %v351_v37 }
 0x262   :  { %v350_v38 = vpop.xlane.xlu0 %349 }
 0x263   :  { %v354_v39 = vsub.f32 %v340_v34, %v350_v38 }
 0x265   :  { %v356_v40 = vmul.f32 1.442695, %v354_v39 }
 0x266   :  { %v353_v41 = vpop.xlane.xlu0 %352 }
 0x267   :  { %714 = vpow2.f32 %v356_v40  ;;  %v355_v42 = vsub.f32 %v345_v35, %v353_v41  ;;  %v584_v41 = vld [vmem:[#allocation10 + $0x2] ss:$0 sm:$0xff] }
 0x269   :  { %v358_v43 = vmul.f32 1.442695, %v355_v42 }
 0x26b   :  { %716 = vpow2.f32 %v358_v43  ;;  %v587_v43 = vld [vmem:[#allocation10 + $0x3] ss:$0 sm:$0xff] }
 0x274   :  { %v715_v44 = vpop.eup %714 }
 0x275   :  { %v360_v45 = vsel %vm112_vm0, %v715_v44, 0.0 }
 0x276   :  { %361 = vadd.xlane.f32.xlu1 %v360_v45 }
 0x278   :  { %v717_v46 = vpop.eup %716 }
 0x279   :  { %v363_v47 = vsel %vm112_vm0, %v717_v46, 0.0 }
 0x27a   :  { %364 = vadd.xlane.f32.xlu1 %v363_v47 }
 0x2ff   :  { %v362_v62 = vpop.xlane.xlu1 %361 }
 0x300   :  { %718 = vrcp.f32 %v362_v62 }
 0x303   :  { %v365_v63 = vpop.xlane.xlu1 %364 }
 0x304   :  { %720 = vrcp.f32 %v365_v63 }
 0x30d   :  { %v719_v0 = vpop.eup %718 }
 0x30e   :  { %v367_v1 = vmul.f32 %v719_v0, %v715_v44 }
 0x310   :  { %665 = vmatprep.mubr.msk.f32.mxu0 %vm112_vm0, %v367_v1 }
 0x311   :  { %v721_v2 = vpop.eup %720 }
 0x312   :  { %v369_v3 = vmul.f32 %v721_v2, %v717_v46 }
 0x314   :  { %666 = vmatmul.mubr.msk.f32.vlgmr.msra.gmra.mxu0 %vm112_vm0, %v369_v3 }
 0x3d4   :  { %v667_v6 = vpop.f32.mrf.mxu0 }
 0x3d6   :  { %v442_v7 = vpop.f32.mrf.mxu0 }
 0x3d7   :  { %700 = vmatprep.mubr.f32.mxu1 %v442_v7 }
 0x3d8   :  { %701 = vmatmul.mubr.f32.vlgmr.msra.gmra.mxu1 %v667_v6 }
 0x498   :  { %v702_v9 = vpop.f32.mrf.mxu1 }
 0x499   :  { %v540_v10 = vadd.f32 %v702_v9, %v467_v8 }
 0x49a   :  { %v534_v11 = vpop.f32.mrf.mxu1 }
 0x49b   :  { %v535_v12 = vadd.f32 %v534_v11, %v467_v8  ;;  %545 = vadd.xlane.f32.xlu1 %v540_v10 }
 0x49d   :  { %543 = vadd.xlane.f32.xlu0 %v535_v12 }
 0x524   :  { %v546_v13 = vpop.xlane.xlu1 %545 }
 0x525   :  { %v548_v14 = vmul.f32 0.03125, %v546_v13 }
 0x526   :  { %v544_v15 = vpop.xlane.xlu0 %543 }
 0x527   :  { %v550_v17 = vsub.f32 %v540_v10, %v548_v14  ;;  %v547_v18 = vmul.f32 0.03125, %v544_v15 }
 0x529   :  { %v549_v19 = vsub.f32 %v535_v12, %v547_v18  ;;  %v553_v20 = vmul.f32 %v551_v16, %v550_v17 }
 0x52b   :  { %v555_v21 = vmul.f32 %v553_v20, %v553_v20  ;;  %v552_v22 = vmul.f32 %v551_v16, %v549_v19 }
 0x52d   :  { %558 = vadd.xlane.f32.xlu1 %v555_v21  ;;  %v554_v23 = vmul.f32 %v552_v22, %v552_v22 }
 0x52f   :  { %556 = vadd.xlane.f32.xlu0 %v554_v23 }
 0x5b6   :  { %v559_v24 = vpop.xlane.xlu1 %558 }
 0x5b7   :  { %v561_v25 = vmul.f32 0.03125, %v559_v24 }
 0x5b8   :  { %v557_v26 = vpop.xlane.xlu0 %556 }
 0x5b9   :  { %v563_v27 = vadd.f32 1e-12, %v561_v25  ;;  %v560_v28 = vmul.f32 0.03125, %v557_v26 }
 0x5bb   :  { %722 = vrsqrt.f32 %v563_v27  ;;  %v562_v29 = vadd.f32 1e-12, %v560_v28  ;;  %vm573_vm1 = vcmp.eq.f32.partialorder %v563_v27, inf  ;;  %v576_v32 = vand.u32 2147483648, %v563_v27 }
 0x5bc   :  { %vm575_vm2 = vcmp.eq.f32.partialorder %v563_v27, 0.0 }
 0x5bd   :  { %724 = vrsqrt.f32 %v562_v29  ;;  %vm566_vm3 = vcmp.eq.f32.partialorder %v562_v29, inf  ;;  %v569_v37 = vand.u32 2147483648, %v562_v29  ;;  %vm568_vm4 = vcmp.eq.f32.partialorder %v562_v29, 0.0 }
 0x5c8   :  { %v723_v30 = vpop.eup %722 }
 0x5c9   :  { %v572_v31 = vmul.f32 %v723_v30, %v563_v27 }
 0x5ca   :  { %v725_v33 = vpop.eup %724 }
 0x5cb   :  { %v574_v34 = vsel %vm573_vm1, %v563_v27, %v572_v31  ;;  %v565_v36 = vmul.f32 %v725_v33, %v562_v29 }
 0x5cc   :  { %v577_v35 = vsel %vm575_vm2, %v576_v32, %v574_v34 }
 0x5cd   :  { %726 = vrcp.f32 %v577_v35  ;;  %v567_v38 = vsel %vm566_vm3, %v562_v29, %v565_v36 }
 0x5ce   :  { %v570_v39 = vsel %vm568_vm4, %v569_v37, %v567_v38 }
 0x5cf   :  { %728 = vrcp.f32 %v570_v39 }
 0x5da   :  { %v727_v40 = vpop.eup %726 }
 0x5db   :  { %v583_v42 = vmul.f32 %v727_v40, %v553_v20 }
 0x5dc   :  { %v729_v44 = vpop.eup %728 }
 0x5dd   :  { %v586_v45 = vmul.f32 %v584_v41, %v583_v42  ;;  %v582_v46 = vmul.f32 %v729_v44, %v552_v22 }
 0x5df   :  { %v589_v47 = vadd.f32 %v587_v43, %v586_v45  ;;  %v585_v48 = vmul.f32 %v584_v41, %v582_v46 }
 0x5e1   :  { %591 = vst [vmem:[#allocation11 + $0x8] sm:$0xff] %v589_v47  ;;  %v588_v49 = vadd.f32 %v587_v43, %v585_v48 }
 0x5e3   :  { %590 = vst [vmem:[#allocation11] sm:$0xff] %v588_v49 }
 0x5e4   :  { %841 = shalt.err (!%p838_p1)
}
 0x5e5   :  { %603 = dma.vmem_to_hbm [thread:$0]  %s598_s4, 256, %s944_s5, [#allocation4], %s860_s23, %s860_s23, %s861_s24  }
 0x5e6   :  { %856 = dma.done.wait [#allocation4], 256  }
 0x5e7   :  { %857 = vsyncadd [#allocation4], 4294967040 }
 0x5e8   :  { %607 = vsyncpa [#allocation3], 1 }
 0x5e9   :  { %608 = vsyncpa [#allocation6], 1 }
 0x5ea   :  { %609 = vsyncpa [#allocation9], 1 }
 0x5eb   :  { %610 = vsyncpa [#allocation4], 1 }

</bundles_post_ra>
